<compile_context>
chip_gen: v5e
topology: v5e:2x2
jax: 0.10.0
libtpu: 0.0.40
codegen_flags: <defaults>
</compile_context>

<pallas_src>
import functools

import jax
import jax.numpy as jnp
from jax import lax
from jax.experimental import pallas as pl
from jax.experimental.pallas import tpu as pltpu


def _round_up(n, m):
    return (n + m - 1) // m * m


def _eca_block(x_ref, w_ref, o_ref, pext_ref, p_prev, p_next, *, hw_true, k_size):
    """Core math for one (tc, HW) channel tile.

    x_ref:    (tc, HW) input tile (input dtype)
    w_ref:    (K,) f32 conv weights in SMEM
    o_ref:    (tc, HW) output tile
    pext_ref: (>= tc + 2*pad, 1) f32 VMEM scratch for the zero-padded pooled vec
    p_prev/p_next: (1, 1) f32 pooled mean of the channel just below/above this
                   tile (already zeroed when out of range).
    """
    tc = x_ref.shape[0]
    pad = (k_size - 1) // 2
    inv_hw = 1.0 / float(hw_true)

    # --- global average pool over the spatial (lane) axis, f32 accumulation ---
    # Block's lane extent equals the true HW, so the reduction is exact.
    p = jnp.sum(x_ref[...], axis=-1, keepdims=True, dtype=jnp.float32) * inv_hw  # (tc, 1)

    # --- k-tap conv over the channel (sublane) axis, zero-padded at tile edges ---
    # Stage the pooled vector into a zeroed scratch at offset `pad`, then read K
    # statically offset windows: y[i] = sum_k w[k] * pext[i + k].
    pext_ref[...] = jnp.zeros_like(pext_ref)
    pext_ref[pad:pad + tc, :] = p
    y = w_ref[0] * pext_ref[0:tc, :]
    for k in range(1, k_size):
        y = y + w_ref[k] * pext_ref[k:k + tc, :]

    # --- cross-tile halo taps (wrapper only tiles channels when k_size == 3) ---
    row = lax.broadcasted_iota(jnp.int32, (tc, 1), 0)
    y = y + w_ref[0] * jnp.where(row == 0, p_prev, 0.0)
    y = y + w_ref[k_size - 1] * jnp.where(row == tc - 1, p_next, 0.0)

    # --- sigmoid gate (f32) and channel-wise rescale in f32, like the reference ---
    gate = jax.nn.sigmoid(y)                                   # (tc, 1) f32
    # Re-read x from the VMEM-resident tile (short live ranges, no big f32 slab
    # held across the conv/sigmoid).
    o_ref[...] = (x_ref[...].astype(jnp.float32) * gate).astype(o_ref.dtype)


def eca_kernel_single(x_ref, w_ref, o_ref, pext_ref, *, hw_true, k_size):
    """One grid step == one full (C, HW) batch slab (no channel tiling)."""
    zero = jnp.zeros((1, 1), jnp.float32)
    _eca_block(x_ref, w_ref, o_ref, pext_ref, zero, zero,
               hw_true=hw_true, k_size=k_size)


def eca_kernel_tiled(x_ref, prev_ref, next_ref, w_ref, o_ref, pext_ref, *,
                     hw_true, k_size):
    """One grid step == one (tc, HW) channel tile with a +-1 channel halo."""
    ci = pl.program_id(1)
    n_ct = pl.num_programs(1)
    inv_hw = 1.0 / float(hw_true)
    hc = prev_ref.shape[0]

    # Pooled mean of the channel just below (last row of prev block) / just
    # above (first row of next block) this tile; zero them at the array edges
    # so the conv sees global zero padding.
    p_prev = jnp.sum(prev_ref[hc - 1:hc, :], axis=-1, keepdims=True,
                     dtype=jnp.float32) * inv_hw                # (1, 1)
    p_next = jnp.sum(next_ref[0:1, :], axis=-1, keepdims=True,
                     dtype=jnp.float32) * inv_hw                # (1, 1)
    p_prev = jnp.where(ci > 0, p_prev, 0.0)
    p_next = jnp.where(ci < n_ct - 1, p_next, 0.0)

    _eca_block(x_ref, w_ref, o_ref, pext_ref, p_prev, p_next,
               hw_true=hw_true, k_size=k_size)


def _pick_channel_tile(C, K, B):
    """Channel tile size: largest multiple-of-8 divisor of C that is <= 128.

    Only tile when it is useful (few batch steps, many channels) and the halo
    logic applies (k_size == 3); otherwise process the full C per step.
    """
    if K != 3 or C % 8 != 0 or C <= 128 or B >= 8:
        return C
    tc = 8
    for cand in range(8, 129, 8):
        if C % cand == 0:
            tc = cand
    if tc < 64:          # halo (2x8 rows) would be too large a fraction of the tile
        return C
    return tc


def eca_forward(x, conv_w):
    """x: (B, C, H, W) NCHW.  conv_w: (1, 1, K) PyTorch Conv1d weight."""
    B, C, H, W = x.shape
    HW = H * W
    K = conv_w.shape[-1]
    pad = (K - 1) // 2

    # No padding / cropping: reshape is free, blocks below use full lane extent.
    x2 = x.reshape(B, C, HW)
    w1 = conv_w.reshape(K).astype(jnp.float32)

    tc = _pick_channel_tile(C, K, B)
    n_ct = C // tc
    itemsize = jnp.dtype(x.dtype).itemsize

    # Clamp the VMEM budget to the chip's physical capacity (v7x has 64 MiB).
    try:
        vmem_cap = pltpu.get_tpu_info().vmem_capacity_bytes
    except Exception:
        vmem_cap = 64 << 20
    halo_rows = 16 if n_ct > 1 else 0
    needed = 2 * (2 * tc + halo_rows) * HW * itemsize + (2 << 20)
    vmem_bytes = int(min(max(2 * needed, 16 << 20), int(0.8 * vmem_cap)))

    # Tiny staging scratch for the zero-padded pooled vector.
    pext_rows = max(_round_up(tc + 2 * pad, 8), 8)
    scratch = [pltpu.VMEM((pext_rows, 1), jnp.float32)]

    if n_ct == 1:
        grid = (B,)
        kernel = functools.partial(eca_kernel_single, hw_true=HW, k_size=K)
        in_specs = [
            pl.BlockSpec((None, C, HW), lambda b: (b, 0, 0)),
            pl.BlockSpec(memory_space=pltpu.MemorySpace.SMEM),
        ]
        out_specs = pl.BlockSpec((None, C, HW), lambda b: (b, 0, 0))
        operands = (x2, w1)
        dims = ("parallel",)
    else:
        cpb = tc // 8  # channel-blocks (of 8 rows) per tile
        grid = (B, n_ct)
        kernel = functools.partial(eca_kernel_tiled, hw_true=HW, k_size=K)
        in_specs = [
            # Main channel tile.
            pl.BlockSpec((None, tc, HW), lambda b, ci: (b, ci, 0)),
            # 8-row halo block whose LAST row is channel c0 - 1 (clamped at 0;
            # masked in-kernel for the first tile).
            pl.BlockSpec((None, 8, HW),
                         lambda b, ci: (b, jnp.maximum(ci * cpb - 1, 0), 0)),
            # 8-row halo block whose FIRST row is channel c0 + tc (clamped at the
            # top; masked in-kernel for the last tile).
            pl.BlockSpec((None, 8, HW),
                         lambda b, ci: (b, jnp.minimum((ci + 1) * cpb, C // 8 - 1), 0)),
            pl.BlockSpec(memory_space=pltpu.MemorySpace.SMEM),
        ]
        out_specs = pl.BlockSpec((None, tc, HW), lambda b, ci: (b, ci, 0))
        operands = (x2, x2, x2, w1)
        dims = ("parallel", "parallel")

    out = pl.pallas_call(
        kernel,
        out_shape=jax.ShapeDtypeStruct((B, C, HW), x.dtype),
        grid_spec=pltpu.PrefetchScalarGridSpec(
            num_scalar_prefetch=0,
            grid=grid,
            in_specs=in_specs,
            out_specs=out_specs,
            scratch_shapes=scratch,
        ),
        compiler_params=pltpu.CompilerParams(
            dimension_semantics=dims,
            vmem_limit_bytes=vmem_bytes),
    )(*operands)

    return out.reshape(B, C, H, W)


def eca_reference(x, conv_w):
    """Pure-JAX reference mirroring the PyTorch forward."""
    B, C, H, W = x.shape
    K = conv_w.shape[-1]
    pad = (K - 1) // 2
    p = jnp.mean(x.astype(jnp.float32), axis=(2, 3))                  # (B, C)
    pp = jnp.pad(p, ((0, 0), (pad, pad)))
    w = conv_w.reshape(K).astype(jnp.float32)
    y = sum(w[k] * pp[:, k:k + C] for k in range(K))                  # (B, C)
    gate = jax.nn.sigmoid(y)[:, :, None, None]
    return (x.astype(jnp.float32) * gate).astype(x.dtype)


if __name__ == "__main__":
    key = jax.random.PRNGKey(0)
    kx, kw, kx2 = jax.random.split(key, 3)

    K = 3
    # Deterministic synthetic init for Conv1d(1, 1, K, bias=False) weight (1, 1, K).
    conv_w = (jax.random.uniform(kw, (1, 1, K), dtype=jnp.float32) - 0.5) * 0.6

    # Case 1: small module-spec shape (untiled path, full-dim blocks, C < 8).
    B, C, H, W = 2, 4, 16, 16
    x = jax.random.normal(kx, (B, C, H, W), dtype=jnp.float32)
    out = jax.block_until_ready(eca_forward(x, conv_w))
    ref = eca_reference(x, conv_w)
    assert out.shape == x.shape and out.dtype == x.dtype
    assert jnp.allclose(out, ref, atol=2e-5, rtol=1e-5)

    # Case 2: exercises the channel-tiled halo path (B=1, C=256, 7x7 spatial,
    # HW not a multiple of 128 -> Mosaic masks the lane remainder).
    x2 = jax.random.normal(kx2, (1, 256, 7, 7), dtype=jnp.float32)
    out2 = jax.block_until_ready(eca_forward(x2, conv_w))
    ref2 = eca_reference(x2, conv_w)
    assert out2.shape == x2.shape and out2.dtype == x2.dtype
    assert jnp.allclose(out2, ref2, atol=2e-5, rtol=1e-5)

    print("KERNEL_OK")
</pallas_src>

<mosaic_0001>
module attributes {stable_mosaic.version = 11 : i64} {
  func.func @eca_kernel_single(%arg0: i32, %arg1: memref<1x4x256xf32, #tpu.memory_space<vmem>>, %arg2: memref<3xf32, #tpu.memory_space<smem>>, %arg3: memref<1x4x256xf32, #tpu.memory_space<vmem>>, %arg4: memref<8x1xf32, #tpu.memory_space<vmem>>) attributes {dimension_semantics = [#tpu.dimension_semantics<parallel>], iteration_bounds = array<i64: 2>, scalar_prefetch = 0 : i64, scratch_operands = 1 : i64, tpu.core_type = #tpu.core_type<tc>, window_params = [{transform_indices = @transform_0, window_bounds = array<i64: 1, 4, 256>}, {transform_indices = @transform_1, window_bounds = array<i64: 3>}, {transform_indices = @transform_2, window_bounds = array<i64: 1, 4, 256>}]} {
    %cst = arith.constant 0.000000e+00 : f32
    %0 = vector.broadcast %cst : f32 to vector<1x1xf32>
    %c0 = arith.constant 0 : index
    %c0_0 = arith.constant 0 : index
    %c0_1 = arith.constant 0 : index
    %1 = vector.load %arg1[%c0, %c0_0, %c0_1] : memref<1x4x256xf32, #tpu.memory_space<vmem>>, vector<1x4x256xf32>
    %2 = vector.shape_cast %1 : vector<1x4x256xf32> to vector<4x256xf32>
    %cst_2 = arith.constant dense<0.000000e+00> : vector<4xf32>
    %3 = vector.multi_reduction <add>, %2, %cst_2 [1] : vector<4x256xf32> to vector<4xf32>
    %4 = vector.shape_cast %3 : vector<4xf32> to vector<4x1xf32>
    %cst_3 = arith.constant 3.906250e-03 : f32
    %5 = vector.broadcast %cst_3 : f32 to vector<4x1xf32>
    %6 = arith.mulf %4, %5 : vector<4x1xf32>
    %cst_4 = arith.constant 0.000000e+00 : f32
    %7 = vector.broadcast %cst_4 : f32 to vector<8x1xf32>
    %c0_5 = arith.constant 0 : index
    %c0_6 = arith.constant 0 : index
    %8 = vector.load %arg4[%c0_5, %c0_6] : memref<8x1xf32, #tpu.memory_space<vmem>>, vector<8x1xf32>
    tpu.vector_store %arg4[%c0_5, %c0_6], %7 {strides = array<i32>} : memref<8x1xf32, #tpu.memory_space<vmem>>, vector<8x1xf32>,
    %c1 = arith.constant 1 : index
    %c0_7 = arith.constant 0 : index
    %9 = vector.load %arg4[%c1, %c0_7] : memref<8x1xf32, #tpu.memory_space<vmem>>, vector<4x1xf32>
    tpu.vector_store %arg4[%c1, %c0_7], %6 {strides = array<i32>} : memref<8x1xf32, #tpu.memory_space<vmem>>, vector<4x1xf32>,
    %c0_8 = arith.constant 0 : index
    %10 = memref.load %arg2[%c0_8] : memref<3xf32, #tpu.memory_space<smem>>
    %c0_9 = arith.constant 0 : index
    %c0_10 = arith.constant 0 : index
    %11 = vector.load %arg4[%c0_9, %c0_10] : memref<8x1xf32, #tpu.memory_space<vmem>>, vector<4x1xf32>
    %12 = vector.broadcast %10 : f32 to vector<4x1xf32>
    %13 = arith.mulf %12, %11 : vector<4x1xf32>
    %c1_11 = arith.constant 1 : index
    %14 = memref.load %arg2[%c1_11] : memref<3xf32, #tpu.memory_space<smem>>
    %c1_12 = arith.constant 1 : index
    %c0_13 = arith.constant 0 : index
    %15 = vector.load %arg4[%c1_12, %c0_13] : memref<8x1xf32, #tpu.memory_space<vmem>>, vector<4x1xf32>
    %16 = vector.broadcast %14 : f32 to vector<4x1xf32>
    %17 = arith.mulf %16, %15 : vector<4x1xf32>
    %18 = arith.addf %13, %17 : vector<4x1xf32>
    %c2 = arith.constant 2 : index
    %19 = memref.load %arg2[%c2] : memref<3xf32, #tpu.memory_space<smem>>
    %c2_14 = arith.constant 2 : index
    %c0_15 = arith.constant 0 : index
    %20 = vector.load %arg4[%c2_14, %c0_15] : memref<8x1xf32, #tpu.memory_space<vmem>>, vector<4x1xf32>
    %21 = vector.broadcast %19 : f32 to vector<4x1xf32>
    %22 = arith.mulf %21, %20 : vector<4x1xf32>
    %23 = arith.addf %18, %22 : vector<4x1xf32>
    %24 = tpu.iota {dimensions = array<i32: 0>} : vector<4x1xi32>
    %c0_16 = arith.constant 0 : index
    %25 = memref.load %arg2[%c0_16] : memref<3xf32, #tpu.memory_space<smem>>
    %c0_i32 = arith.constant 0 : i32
    %26 = vector.broadcast %c0_i32 : i32 to vector<4x1xi32>
    %27 = arith.cmpi eq, %24, %26 : vector<4x1xi32>
    %cst_17 = arith.constant 0.000000e+00 : f32
    %28 = vector.shape_cast %0 : vector<1x1xf32> to vector<1x1xf32>
    %29 = vector.broadcast %28 : vector<1x1xf32> to vector<4x1xf32>
    %30 = vector.broadcast %cst_17 : f32 to vector<4x1xf32>
    %31 = arith.select %27, %29, %30 : vector<4x1xi1>, vector<4x1xf32>
    %32 = vector.broadcast %25 : f32 to vector<4x1xf32>
    %33 = arith.mulf %32, %31 : vector<4x1xf32>
    %34 = arith.addf %23, %33 : vector<4x1xf32>
    %c2_18 = arith.constant 2 : index
    %35 = memref.load %arg2[%c2_18] : memref<3xf32, #tpu.memory_space<smem>>
    %c3_i32 = arith.constant 3 : i32
    %36 = vector.broadcast %c3_i32 : i32 to vector<4x1xi32>
    %37 = arith.cmpi eq, %24, %36 : vector<4x1xi32>
    %cst_19 = arith.constant 0.000000e+00 : f32
    %38 = vector.shape_cast %0 : vector<1x1xf32> to vector<1x1xf32>
    %39 = vector.broadcast %38 : vector<1x1xf32> to vector<4x1xf32>
    %40 = vector.broadcast %cst_19 : f32 to vector<4x1xf32>
    %41 = arith.select %37, %39, %40 : vector<4x1xi1>, vector<4x1xf32>
    %42 = vector.broadcast %35 : f32 to vector<4x1xf32>
    %43 = arith.mulf %42, %41 : vector<4x1xf32>
    %44 = arith.addf %34, %43 : vector<4x1xf32>
    %45 = arith.negf %44 : vector<4x1xf32>
    %46 = math.exp %45 : vector<4x1xf32>
    %cst_20 = arith.constant 1.000000e+00 : f32
    %47 = vector.broadcast %cst_20 : f32 to vector<4x1xf32>
    %48 = arith.addf %47, %46 : vector<4x1xf32>
    %49 = arith.divf %47, %48 : vector<4x1xf32>
    %c0_21 = arith.constant 0 : index
    %c0_22 = arith.constant 0 : index
    %c0_23 = arith.constant 0 : index
    %50 = vector.load %arg1[%c0_21, %c0_22, %c0_23] : memref<1x4x256xf32, #tpu.memory_space<vmem>>, vector<1x4x256xf32>
    %51 = vector.shape_cast %50 : vector<1x4x256xf32> to vector<4x256xf32>
    %52 = vector.broadcast %49 : vector<4x1xf32> to vector<4x256xf32>
    %53 = arith.mulf %51, %52 : vector<4x256xf32>
    %c0_24 = arith.constant 0 : index
    %c0_25 = arith.constant 0 : index
    %c0_26 = arith.constant 0 : index
    %54 = vector.load %arg3[%c0_24, %c0_25, %c0_26] : memref<1x4x256xf32, #tpu.memory_space<vmem>>, vector<1x4x256xf32>
    %55 = vector.shape_cast %54 : vector<1x4x256xf32> to vector<4x256xf32>
    %56 = vector.shape_cast %53 : vector<4x256xf32> to vector<1x4x256xf32>
    tpu.vector_store %arg3[%c0_24, %c0_25, %c0_26], %56 {strides = array<i32>} : memref<1x4x256xf32, #tpu.memory_space<vmem>>, vector<1x4x256xf32>,
    return
  }
  func.func @transform_0(%arg0: i32) -> (i32, i32, i32) {
    %c0_i32 = arith.constant 0 : i32
    %c0_i32_0 = arith.constant 0 : i32
    %c0_i32_1 = arith.constant 0 : i32
    return %arg0, %c0_i32, %c0_i32_0 : i32, i32, i32
  }
  func.func @transform_1(%arg0: i32) -> i32 {
    %c0_i32 = arith.constant 0 : i32
    %c0_i32_0 = arith.constant 0 : i32
    return %c0_i32 : i32
  }
  func.func @transform_2(%arg0: i32) -> (i32, i32, i32) {
    %c0_i32 = arith.constant 0 : i32
    %c0_i32_0 = arith.constant 0 : i32
    %c0_i32_1 = arith.constant 0 : i32
    return %arg0, %c0_i32, %c0_i32_0 : i32, i32, i32
  }
}

</mosaic_0001>

<bundles_post_ra>
// kernel: tpu_custom_call.1
= control target key start
LH: loop header
LB: loop body
LE: loop exit
PB: predicated region body
PF: predicated region fallthrough
CT: control target
= control target key end

     0   :  { %7 = vsyncpa [#allocation4], 0  ;;  %s710_s0 = inlined_call_operand.hbm [shape: f32[2,4,256], index: 0, kind: input, shape index: {}]   ;;  %s711_s1 = inlined_call_operand.hbm [shape: f32[3], index: 1, kind: input, shape index: {}]   ;;  %s712_s2 = inlined_call_operand.hbm [shape: f32[2,4,256], index: 2, kind: output, shape index: {}]  }
   0x1   :  { %9 = vsyncpa [#allocation4 + $0x1], 0 }
   0x2   :  { %10 = vsyncpa [#allocation6], 0 }
   0x3   :  { %11 = vsyncpa [#allocation5], 0 }
   0x4   :  { %13 = vsyncpa [#allocation5 + $0x1], 0  ;;  %s564_s9 = smov 0   ;;  %s566_s10 = smov 0  }
   0x5   :  { %s568_s11 = smov 0   ;;  %s570_s12 = smov 0  }
   0x6 LB: > { %s585_s13 = sadd.s32 4294967295, %s543_s12   ;;  %s342_s14 = sadd.s32 4294967294, %s543_s12   ;;  %s543_s12 = sphi %s570_s12, %s722_s12   ;;  %s539_s11 = sphi %s568_s11, %s721_s11   ;;  %s535_s10 = sphi %s566_s10, %s720_s10   ;;  %s531_s9 = sphi %s564_s9, %s719_s9  }
   0x7   : > { %p39_p0 = scmp.ne.s32.totalorder %s535_s10, %s531_s9  ;;  %p40_p1 = scmp.eq.s32.totalorder %s585_s13, 0 }
   0x8   : > { %p84_p2 = scmp.eq.s32.totalorder %s585_s13, 1  ;;  %p90_p3 = scmp.eq.s32.totalorder %s342_s14, 1 }
   0x9   : > { %p594_p4 = por %p40_p1, %p39_p0  ;;  %p343_p5 = scmp.ge.s32.totalorder %s543_s12, 1 }
   0xa   : > { %p599_p6 = por %p90_p3, %p39_p0  ;;  %p97_p7 = scmp.lt.s32.totalorder %s543_s12, 3 }
   0xb   : > { %s109_s19 = sshll.u32 %s711_s1, 4  ;;  %s615_s21 = sadd.s32 1, %s543_s12   ;;  %s110_s19 = int_to_ptr.hbm [resolvable:$true] %s109_s19 }
   0xc   : > { %p607_p8 = pnand %p343_p5, %p97_p7  ;;  %s23_s22 = ssub.s32 %s543_s12, %s615_s21 }
   0xd   : > { %p24_p12 = scmp.eq.s32.totalorder %s23_s22, 0  ;;  %s26_s23 = sadd.s32 1, %s539_s11 }
   0xe   : > { %p371_p10 = pneg %p607_p8  ;;  %p33_p13 = scmp.ne.s32.totalorder %s539_s11, %s535_s10 }
   0xf   : > { %s545_s24 = smov [#allocation7]   ;;  %p34_p0 = scmp.eq.s32.totalorder %s543_s12, 0 }
  0x10   : > { %p372_p11 = pnand %p371_p10, %p40_p1  ;;  %p630_p3 = por %p84_p2, %p33_p13 }
  0x11   : > { %s625_s25 = scalar_select %p24_p12, %s539_s11, %s26_s23  }
  0x12   : > { %374 = dma.hbm_to_smem (!%p372_p11), %s110_s19, 16, %s545_s24, [#allocation6]  }
  0x13   : > { %s120_s27 = sand.u32 1, %s539_s11   ;;  %p35_p5 = por %p34_p0, %p33_p13 }
  0x14   : > { %p384_p7 = scmp.lt.s32.totalorder %s543_s12, 2  ;;  %s346_s28 = sshll.u32 %s120_s27, 3 }
  0x15   : > { %s361_s29 = sshll.u32 %s543_s12, 3  ;;  %s124_s6 = scalar_lea.vmem [#allocation3], %s346_s28 }
  0x16   : > { %s129_s4 = scalar_lea.hbm %s710_s0, %s361_s29  ;;  %s133_s7 = sshll.u32 %s124_s6, 4  ;;  %s134_s7 = int_to_ptr.vmem [resolvable:$true] %s133_s7 }
  0x17   : > { %s131_s5 = sshll.u32 %s129_s4, 4  ;;  %p640_p10 = pnand %p384_p7, %p35_p5  ;;  %s132_s5 = int_to_ptr.hbm [resolvable:$true] %s131_s5 }
  0x18   : > { %s121_s14 = scalar_lea.sflag [#allocation4], %s120_s27  ;;  %s443_s17 = sshra.s32 %s132_s5, 4  ;;  %s444_s17 = int_to_ptr.hbm [resolvable:$true] %s443_s17 }
  0x19   : > { %s445_s18 = scalar_lea.hbm %s444_s17, 8  ;;  %p447_p11 = pneg %p640_p10 }
  0x1a   : > { %p446_p2 = scmp.ne.s32.totalorder %s444_s17, %s445_s18  ;;  %s450_s23 = scalar_lea.hbm %s710_s0, 16 }
  0x1b   : > { %p451_p0 = scmp.lt.s32.totalorder %s444_s17, %s710_s0  ;;  %p452_p5 = scmp.lt.s32.totalorder %s450_s23, %s445_s18 }
  0x1c   : > { %p448_p12 = pnand %p447_p11, %p446_p2 }
  0x1d   : > { %p453_p7 = por %p452_p5, %p451_p0 }
  0x1e   : > { %p449_p13 = pneg %p448_p12 }
  0x20   : > { %p454_p9 = pnand %p453_p7, %p449_p13 }
  0x22   : > { %457 = shalt.err (!%p454_p9)
}
  0x23   : > { %378 = dma.hbm_to_vmem [thread:$0]  (!%p640_p10), %s132_s5, 128, %s134_s7, %s121_s14  }
  0x24   : > { %142 = sbr.rel (%p607_p8) target bundleno = 345 (0x159), region = 28  ;;  %s657_s27 = sand.u32 (!%p607_p8), 1, %s535_s10  }
  0x25   : > { %s350_s29 = sshll.u32 (!%p607_p8), %s657_s27, 3  ;;  %s145_s30 = scalar_lea.sflag (!%p607_p8), [#allocation4], %s657_s27 }
  0x26   : > { %s148_s3 = scalar_lea.vmem (!%p607_p8), [#allocation3], %s350_s29 }
  0x29   : > { %518 = dma.done.wait (%p594_p4), %s145_s30, 128  }
  0x2a   : > { %520 = vsyncadd (%p594_p4), %s145_s30, 4294967168 }
  0x2b   : > { %522 = dma.done.wait (%p40_p1), [#allocation6], 16  }
  0x2c   : > { %524 = vsyncadd (%p40_p1), [#allocation6], 4294967280 }
  0x2d   : > { %159 = sfence }
  0x2e   : > { %v671_v0 = vld [vmem:[%s148_s3] sm:$0xff]  ;;  %vm190_vm0 = vcmask 7168   ;;  %v546_v1 = vmov 0.0   ;;  %vm183_vm1 = vcmask 1043456   ;;  %v547_v7 = vmov 0   ;;  %s194_s15 = sld [smem:[#allocation7]] }
  0x2f   : > { %178 = vst [vmem:[#allocation1] ss:$2 sm:$0xff] %v671_v0  ;;  %423 = vset.pattern.permute.xlu0 %v547_v7  ;;  %vm192_vm2 = vcmask 3072   ;;  %s353_s20 = sld [smem:[#allocation7 + $0x1]]  ;;  %v548_v38 = vmov 839922192  }
  0x30   : > { %191 = vst.msk [vmem:[#allocation2] sm:$0xff] %vm190_vm0, %v546_v1  ;;  %s354_s4 = sld [smem:[#allocation7 + $0x2]]  ;;  %v237_v39 = vunpack.c.l.s4 %v548_v38  ;;  %s362_s5 = sshll.u32 %s585_s13, 3 }
  0x31   : > { %s255_s8 = scalar_lea.hbm %s712_s2, %s362_s5  ;;  %s175_s14 = scalar_lea.vmem [#allocation8], %s350_s29 }
  0x32   : > { %v238_v40 = vunpack.c.0.s8 %v237_v39  ;;  %s257_s17 = sshll.u32 %s175_s14, 4  ;;  %s259_s18 = sshll.u32 %s255_s8, 4  ;;  %s258_s17 = int_to_ptr.vmem [resolvable:$true] %s257_s17  ;;  %s260_s18 = int_to_ptr.hbm [resolvable:$true] %s259_s18 }
  0x33   : > { %s244_s19 = scalar_lea.sflag [#allocation5], %s657_s27  ;;  %s487_s22 = sshra.s32 %s260_s18, 4  ;;  %s488_s22 = int_to_ptr.hbm [resolvable:$true] %s487_s22 }
  0x34   : > { %v196_v10 = vstv %s194_s15  ;;  %s489_s13 = scalar_lea.hbm %s488_s22, 8  ;;  %s493_s28 = scalar_lea.hbm %s712_s2, 16 }
  0x35   : > { %v200_v11 = vstv %s353_s20  ;;  %v208_v20 = vmul.f32 0.0, %v196_v10  ;;  %p490_p1 = scmp.ne.s32.totalorder %s488_s22, %s489_s13  ;;  %p494_p9 = scmp.lt.s32.totalorder %s488_s22, %s712_s2 }
  0x36   : > { %v179_v2 = vld.sshfl [vmem:[#allocation1] sm:$0xff pattern:$0x75316420]  ;;  %v180_v3 = vld.sshfl [vmem:[#allocation1 + $0x8] sm:$0xff pattern:$0x75316420]  ;;  %v205_v15 = vstv %s354_s4  ;;  %p495_p10 = scmp.lt.s32.totalorder %s493_s28, %s489_s13 }
  0x37   : > { %v184_v4 = vsel %vm183_vm1, %v179_v2, 0.0  ;;  %v185_v5 = vsel %vm183_vm1, %v180_v3, 0.0  ;;  %v210_v22 = vmul.f32 0.0, %v205_v15  ;;  %p491_p4 = pnand %p490_p1, %p630_p3 }
  0x38   : > { %v186_v6 = vadd.f32 %v185_v5, %v184_v4  ;;  %p496_p2 = por %p495_p10, %p494_p9 }
  0x39   : > { %p492_p8 = pneg %p491_p4 }
  0x3a   : > { %187 = vadd.xlane.f32.xlu0 %v186_v6 }
  0x3b   : > { %p497_p11 = pnand %p496_p2, %p492_p8 }
  0xad   : > { %v188_v8 = vpop.xlane.xlu0 %187 }
  0xae   : > { %v189_v9 = vmul.f32 0.00390625, %v188_v8 }
  0xb0   : > { %193 = vst.msk [vmem:[#allocation2 + $0x1] sm:$0xf] %vm192_vm2, %v189_v9 }
  0xb7   : > { %v195_v12 = vld [vmem:[#allocation2] sm:$0xf] }
  0xb8   : > { %v199_v13 = vld [vmem:[#allocation2 + $0x1] sm:$0xf]  ;;  %v197_v16 = vmul.f32 %v196_v10, %v195_v12 }
  0xb9   : > { %v204_v14 = vld [vmem:[#allocation2 + $0x2] sm:$0xf]  ;;  %v201_v17 = vmul.f32 %v200_v11, %v199_v13 }
  0xba   : > { %v206_v19 = vmul.f32 %v205_v15, %v204_v14 }
  0xbb   : > { %v202_v18 = vadd.f32 %v201_v17, %v197_v16 }
  0xbd   : > { %v207_v21 = vadd.f32 %v206_v19, %v202_v18 }
  0xbf   : > { %v209_v23 = vadd.f32 %v208_v20, %v207_v21 }
  0xc1   : > { %v211_v24 = vadd.f32 %v210_v22, %v209_v23 }
  0xc3   : > { %v355_v25 = vmul.f32 -1.442695, %v211_v24 }
  0xc5   : > { %424 = vpow2.f32 %v355_v25 }
  0xcb   : > { %v425_v26 = vpop.eup %424 }
  0xcc   : > { %v215_v27 = vadd.f32 1.0, %v425_v26 }
  0xce   : > { %426 = vrcp.f32 %v215_v27  ;;  %v227_v31 = vand.u32 2147483648, %v215_v27  ;;  %v225_v33 = vand.u32 2147483647, %v215_v27  ;;  %vm221_vm4 = vweird.f32 %v215_v27 }
  0xd0   : > { %v228_v35 = vor.u32 1.1754944e-38, %v227_v31  ;;  %vm226_vm6 = vcmp.eq.f32.partialorder %v225_v33, 8.507059e+37 }
  0xd4   : > { %v427_v28 = vpop.eup %426 }
  0xd5   : > { %v217_v29 = vmul.f32 %v427_v28, %v215_v27  ;;  %vm222_vm3 = vweird.f32 %v427_v28 }
  0xd6   : > { %vm223_vm5 = vmor %vm221_vm4, %vm222_vm3 }
  0xd7   : > { %v218_v30 = vsub.f32 1.0, %v217_v29 }
  0xd9   : > { %v219_v32 = vmul.f32 %v427_v28, %v218_v30 }
  0xdb   : > { %v220_v34 = vadd.f32 %v427_v28, %v219_v32 }
  0xdd   : > { %v224_v36 = vsel %vm223_vm5, %v427_v28, %v220_v34 }
  0xde   : > { %v229_v37 = vsel %vm226_vm6, %v228_v35, %v224_v36 }
  0xdf   : > { %234 = vperm.xlu0 %423, %v229_v37  }
 0x151   : > { %v235_v41 = vpop.permute.xlu0 %234 }
 0x152   : > { %v239_v42 = vperm.slane %v235_v41, %v238_v40 }
 0x154   : > { %v241_v43 = vmul.f32 %v239_v42, %v671_v0 }
 0x156   : > { %242 = vst [vmem:[%s175_s14] sm:$0xff] %v241_v43 }
 0x157   : > { %500 = shalt.err (!%p497_p11)
}
 0x158   : > { %369 = dma.vmem_to_hbm [thread:$0]  (%p630_p3), %s258_s17, 128, %s260_s18, %s244_s19  }
 0x159 PF: > { %s271_s27 = sand.u32 1, %s531_s9   ;;  %p718_p12 = scmp.ge.s32.totalorder %s543_s12, 2 }
 0x15a   : > { %s272_s3 = scalar_lea.sflag [#allocation5], %s271_s27 }
 0x15b   : > { %p380_p13 = pnand %p718_p12, %p599_p6 }
 0x15d   : > { %p381_p0 = pneg %p380_p13 }
 0x15f   : > { %526 = dma.done.wait (%p381_p0), %s272_s3, 128  }
 0x160   : > { %528 = vsyncadd (%p381_p0), %s272_s3, 4294967168  ;;  %p16_p5 = scmp.ge.s32.totalorder %s615_s21, 4   ;;  %s719_s9 = smov %s535_s10 }
 0x161   : > { %s720_s10 = smov %s539_s11  ;;  %s721_s11 = smov %s625_s25 }
 0x162   : > { %s722_s12 = smov %s615_s21  ;;  %18 = sbr.rel (!%p16_p5) target bundleno = 6 (0x6), region = 78 }
 0x167   :  { %278 = vsyncpa [#allocation4], 1 }
 0x168   :  { %280 = vsyncpa [#allocation4 + $0x1], 1 }
 0x169   :  { %281 = vsyncpa [#allocation5], 1 }
 0x16a   :  { %283 = vsyncpa [#allocation5 + $0x1], 1 }
 0x16b   :  { %284 = vsyncpa [#allocation6], 1 }
 0x16c   :  { %286 = vsyncpa [#allocation6 + $0x1], 1 }

</bundles_post_ra>
